<compile_context>
chip_gen: v7x
topology: tpu7x:2x2x1
jax: 0.10.0
libtpu: 0.0.40
codegen_flags: <defaults>
</compile_context>

<pallas_src>
import functools

import numpy as np

import jax
import jax.numpy as jnp
from jax import lax
from jax.experimental import pallas as pl
from jax.experimental.pallas import tpu as pltpu


# ---------------------------------------------------------------------------
# Helpers
# ---------------------------------------------------------------------------

def _pow_int_or_general(x, gamma):
    """x**gamma, specialized to plain multiplies for small integer gamma."""
    g = float(gamma)
    if g == int(g) and 0.0 <= g <= 8.0:
        n = int(g)
        if n == 0:
            return jnp.ones_like(x)
        out = x
        for _ in range(n - 1):
            out = out * x
        return out
    return jnp.power(x, g)


def _focal_from_pt(p_t, gamma, smooth):
    """-(1-pt)^gamma * log(pt), including label smoothing + epsilon."""
    if smooth is not None:
        # torch.clamp(one_hot, smooth, 1-smooth) applied analytically.
        v_t = min(max(1.0, smooth), 1.0 - smooth)   # value at the target class
        v_n = min(max(0.0, smooth), 1.0 - smooth)   # value at the other classes
        pt = v_n + (v_t - v_n) * p_t
    else:
        pt = p_t
    pt = pt + 1e-10
    return -_pow_int_or_general(1.0 - pt, gamma) * jnp.log(pt)


@functools.lru_cache(maxsize=1)
def _tpu_defaults():
    """(tile_bytes, vmem_limit_bytes) tuned per TPU generation."""
    kind = ""
    try:
        kind = jax.devices()[0].device_kind.lower()
    except Exception:  # pragma: no cover - defensive only
        pass
    if "v5" in kind:                      # 16 MiB scoped default -> stay small
        return 1 << 20, 32 << 20
    if "v6" in kind:                      # 128 MiB VMEM -> amortize step cost
        return 4 << 20, 96 << 20
    if "v7" in kind or "7x" in kind:      # 64 MiB VMEM per TC -> keep headroom
        return 2 << 20, 48 << 20
    return 2 << 20, 48 << 20


# ---------------------------------------------------------------------------
# Kernels
# ---------------------------------------------------------------------------

def _focal_loss_nchw_kernel(logit_ref, tgt_ref, out_ref, *, alpha_vals, gamma,
                            smooth, s_last, block_s):
    """Dense (NCHW) path.  Blocks: logits (C, R, TS), targets (1, R, TS)."""
    num_class = logit_ref.shape[0]
    tgt = tgt_ref[0].astype(jnp.int32)                      # (R, TS)

    # Running max over classes: C-1 full-occupancy (R, TS) elementwise maxes.
    m = logit_ref[0]
    for c in range(1, num_class):
        m = jnp.maximum(m, logit_ref[c])

    # exp / denom / target-class gathers, unrolled over the small static class
    # count so every op is a full (R, TS) vreg tile (no padded sublanes).
    denom = None
    e_t = None
    alpha_g = None
    for c in range(num_class):
        # Subtract in the native dtype; widen to f32 only at the exp.
        e_c = jnp.exp((logit_ref[c] - m).astype(jnp.float32))
        hit = tgt == c
        denom = e_c if denom is None else denom + e_c
        g_c = jnp.where(hit, e_c, 0.0)
        e_t = g_c if e_t is None else e_t + g_c
        a_c = jnp.where(hit, alpha_vals[c], 0.0)
        alpha_g = a_c if alpha_g is None else alpha_g + a_c

    p_t = e_t / denom                                        # (R, TS)
    focal = _focal_from_pt(p_t, gamma, smooth)               # (R, TS)

    # Spatial tail (compiled in only when needed).  All math above is per-lane
    # (no cross-lane mixing), so masking garbage/NaN tail lanes here with a
    # select (not a multiply) is sufficient and NaN-safe.
    if s_last % block_s != 0:
        lane = lax.broadcasted_iota(jnp.int32, focal.shape, 1)
        valid = (pl.program_id(1) * block_s + lane) < s_last
        focal = jnp.where(valid, focal, 0.0)
        alpha_g = jnp.where(valid, alpha_g, 0.0)

    # Two partials packed into one (1, 2) output block -> a single output DMA
    # per grid step.  (Per-tile f32 sums; partials are re-summed outside.)
    sa = jnp.sum(jnp.sum(alpha_g, axis=1, keepdims=True), axis=0, keepdims=True)
    sf = jnp.sum(jnp.sum(focal, axis=1, keepdims=True), axis=0, keepdims=True)
    out_ref[:, 0:1] = sa
    out_ref[:, 1:2] = sf


def _focal_loss_2d_kernel(logit_ref, tgt_ref, out_ref, *, alpha_vals, gamma,
                          smooth, n_total, block_n):
    """Plain (N, C) path.  Rows on sublanes, classes on lanes (no transpose)."""
    num_class = logit_ref.shape[1]
    x = logit_ref[...]                                       # (TN, C) native
    tgt = tgt_ref[...].astype(jnp.int32)                     # (TN, 1)

    m = jnp.max(x, axis=1, keepdims=True)                    # lane reduce (XLU)
    e = jnp.exp((x - m).astype(jnp.float32))                 # (TN, C)
    denom = jnp.sum(e, axis=1, keepdims=True)                # (TN, 1)

    classes = lax.broadcasted_iota(jnp.int32, e.shape, 1)    # (TN, C)
    one_hot = classes == tgt
    e_t = jnp.sum(jnp.where(one_hot, e, 0.0), axis=1, keepdims=True)
    p_t = e_t / denom                                        # (TN, 1)
    focal = _focal_from_pt(p_t, gamma, smooth)               # (TN, 1)

    alpha_g = None
    for c in range(num_class):
        a_c = jnp.where(tgt == c, alpha_vals[c], 0.0)        # (TN, 1)
        alpha_g = a_c if alpha_g is None else alpha_g + a_c

    if n_total % block_n != 0:
        row = lax.broadcasted_iota(jnp.int32, focal.shape, 0)
        valid = (pl.program_id(0) * block_n + row) < n_total
        focal = jnp.where(valid, focal, 0.0)
        alpha_g = jnp.where(valid, alpha_g, 0.0)

    out_ref[:, 0:1] = jnp.sum(alpha_g, axis=0, keepdims=True)
    out_ref[:, 1:2] = jnp.sum(focal, axis=0, keepdims=True)


# ---------------------------------------------------------------------------
# Wrapper
# ---------------------------------------------------------------------------

def focal_loss(logits, target, *, alpha=None, gamma=2.0, smooth=None,
               size_average=True, tile_bytes=None, vmem_limit_bytes=None):
    """Pallas TPU implementation of FocalLoss.forward."""
    num_class = logits.shape[1]

    if smooth is not None and (smooth < 0 or smooth > 1.0):
        raise ValueError('smooth value should be in [0,1]')

    # alpha handling mirrors FocalLoss.__init__; values are concrete and get
    # baked into the kernel as constants (no alpha DMA stream).
    if alpha is None:
        alpha_vec = np.ones((num_class,), np.float32)
    else:
        alpha_vec = np.asarray(alpha, np.float32).reshape(num_class)
        alpha_vec = alpha_vec / alpha_vec.sum()
    alpha_vals = tuple(float(v) for v in alpha_vec)

    dflt_tile, dflt_vmem = _tpu_defaults()
    if tile_bytes is None:
        tile_bytes = dflt_tile
    if vmem_limit_bytes is None:
        vmem_limit_bytes = dflt_vmem

    # Keep narrow integer label dtypes (int8/int16/int32) end-to-end; widen
    # inside the kernel.  Anything else is normalized to int32.
    if target.dtype not in (jnp.dtype(jnp.int8), jnp.dtype(jnp.int16),
                            jnp.dtype(jnp.int32)):
        target = target.astype(jnp.int32)

    if logits.ndim > 2:
        # ---- dense NCHW(...) path -------------------------------------------------
        b = logits.shape[0]
        s = 1
        for d in logits.shape[2:]:
            s *= d
        # Free row-major reshape: pack 8 spatial sub-rows onto sublanes when
        # possible so all per-pixel ops run at full sublane occupancy.
        r = 8 if s % 8 == 0 else 1
        s_last = s // r
        x = logits.reshape(b, num_class, r, s_last)
        tgt = target.reshape(b, 1, r, s_last)

        itemsize = jnp.dtype(x.dtype).itemsize
        ts = max(128, (tile_bytes // (num_class * r * itemsize)) // 128 * 128)
        if ts >= s_last:
            ts = s_last
        n_s = pl.cdiv(s_last, ts)

        kernel = functools.partial(
            _focal_loss_nchw_kernel, alpha_vals=alpha_vals, gamma=float(gamma),
            smooth=smooth, s_last=s_last, block_s=ts)

        parts = pl.pallas_call(
            kernel,
            out_shape=jax.ShapeDtypeStruct((b, n_s, 1, 2), jnp.float32),
            grid_spec=pltpu.PrefetchScalarGridSpec(
                num_scalar_prefetch=0,
                grid=(b, n_s),
                in_specs=[
                    pl.BlockSpec((None, num_class, r, ts),
                                 lambda i, j: (i, 0, 0, j)),          # logits
                    pl.BlockSpec((None, 1, r, ts),
                                 lambda i, j: (i, 0, 0, j)),          # targets
                ],
                out_specs=pl.BlockSpec((None, None, 1, 2),
                                       lambda i, j: (i, j, 0, 0)),
            ),
            compiler_params=pltpu.CompilerParams(
                dimension_semantics=("parallel", "parallel"),
                vmem_limit_bytes=vmem_limit_bytes),
        )(x, tgt)
        m_rows = b * s
    else:
        # ---- plain (N, C) classification path (transpose-free) --------------------
        n, c = logits.shape
        tgt = target.reshape(n, 1)
        itemsize = jnp.dtype(logits.dtype).itemsize
        tn = max(8, (tile_bytes // (c * itemsize)) // 8 * 8)
        if tn >= n:
            tn = n
        n_b = pl.cdiv(n, tn)

        kernel = functools.partial(
            _focal_loss_2d_kernel, alpha_vals=alpha_vals, gamma=float(gamma),
            smooth=smooth, n_total=n, block_n=tn)

        parts = pl.pallas_call(
            kernel,
            out_shape=jax.ShapeDtypeStruct((n_b, 1, 2), jnp.float32),
            grid_spec=pltpu.PrefetchScalarGridSpec(
                num_scalar_prefetch=0,
                grid=(n_b,),
                in_specs=[
                    pl.BlockSpec((tn, c), lambda i: (i, 0)),           # logits
                    pl.BlockSpec((tn, 1), lambda i: (i, 0)),           # targets
                ],
                out_specs=pl.BlockSpec((None, 1, 2), lambda i: (i, 0, 0)),
            ),
            compiler_params=pltpu.CompilerParams(
                dimension_semantics=("parallel",),
                vmem_limit_bytes=vmem_limit_bytes),
        )(logits, tgt)
        m_rows = n

    # Combine partials; reproduces PyTorch's (M,1,M) broadcast:
    #   loss.mean() == (sum alpha)*(sum focal)/M^2 ; loss.sum() == product.
    total = jnp.sum(parts[..., 0]) * jnp.sum(parts[..., 1])
    if size_average:
        total = total / float(m_rows * m_rows)
    return total


# ---------------------------------------------------------------------------
# Pure-JAX reference (transcription of the PyTorch forward, incl. broadcast)
# ---------------------------------------------------------------------------

def _reference_focal_loss(logits, target, num_class, alpha=None, gamma=2.0,
                          smooth=None, size_average=True):
    if alpha is None:
        alpha_v = jnp.ones((num_class,), jnp.float32)
    else:
        alpha_v = jnp.asarray(alpha, jnp.float32).reshape(num_class)
        alpha_v = alpha_v / jnp.sum(alpha_v)
    p = jax.nn.softmax(logits.astype(jnp.float32), axis=1)
    if logits.ndim > 2:
        bb, cc = logits.shape[0], logits.shape[1]
        p = jnp.transpose(p.reshape(bb, cc, -1), (0, 2, 1)).reshape(-1, cc)
    t = target.reshape(-1)
    one_hot = jax.nn.one_hot(t, num_class, dtype=jnp.float32)
    if smooth is not None:
        one_hot = jnp.clip(one_hot, smooth, 1.0 - smooth)
    pt = jnp.sum(one_hot * p, axis=1) + 1e-10
    logpt = jnp.log(pt)
    focal = -jnp.power(1.0 - pt, gamma) * logpt
    a = alpha_v[t]
    total = jnp.sum(a) * jnp.sum(focal)          # (M,1,M) broadcast collapsed
    m = t.shape[0]
    return total / (m * m) if size_average else total


if __name__ == "__main__":
    key = jax.random.PRNGKey(0)
    ks = jax.random.split(key, 8)

    # Case 1: NCHW, S % 8 == 0 -> packed (B, C, 8, S/8) path, single block.
    B, C, H, W = 2, 4, 16, 16
    logits = jax.random.normal(ks[0], (B, C, H, W), jnp.float32)
    target = jax.random.randint(ks[1], (B, H, W), 0, C, jnp.int32)
    loss = focal_loss(logits, target, gamma=2.0, size_average=True)
    jax.block_until_ready(loss)
    ref = _reference_focal_loss(logits, target, C, gamma=2.0, size_average=True)
    assert jnp.allclose(loss, ref, rtol=1e-4, atol=1e-6), (loss, ref)

    # Case 2: packed path with multiple spatial blocks + lane-tail mask
    # (S = 1600 -> S/8 = 200 lanes, forced tile of 128 lanes).
    B2, C2, H2, W2 = 2, 4, 40, 40
    logits2 = jax.random.normal(ks[2], (B2, C2, H2, W2), jnp.float32)
    target2 = jax.random.randint(ks[3], (B2, H2, W2), 0, C2, jnp.int32)
    loss2 = focal_loss(logits2, target2, gamma=2.0, size_average=True,
                       tile_bytes=16384)
    jax.block_until_ready(loss2)
    ref2 = _reference_focal_loss(logits2, target2, C2, gamma=2.0,
                                 size_average=True)
    assert jnp.allclose(loss2, ref2, rtol=1e-4, atol=1e-6), (loss2, ref2)

    # Case 3: ragged spatial extent (S % 8 != 0) -> unpacked fallback + tail
    # mask, explicit alpha + label smoothing + sum reduction.
    B3, C3, H3, W3 = 2, 4, 9, 17                 # S = 153
    logits3 = jax.random.normal(ks[4], (B3, C3, H3, W3), jnp.float32)
    target3 = jax.random.randint(ks[5], (B3, H3, W3), 0, C3, jnp.int32)
    alpha3 = [1.0, 2.0, 3.0, 4.0]
    loss3 = focal_loss(logits3, target3, alpha=alpha3, gamma=2.0, smooth=0.1,
                       size_average=False, tile_bytes=2048)
    jax.block_until_ready(loss3)
    ref3 = _reference_focal_loss(logits3, target3, C3, alpha=alpha3, gamma=2.0,
                                 smooth=0.1, size_average=False)
    assert jnp.allclose(loss3, ref3, rtol=1e-4, atol=1e-5), (loss3, ref3)

    # Case 4: plain (N, C) classification path -- transpose-free 2-D kernel
    # with multiple row blocks and a sublane-tail mask.
    N4, C4 = 37, 5
    logits4 = jax.random.normal(ks[6], (N4, C4), jnp.float32)
    target4 = jax.random.randint(ks[7], (N4,), 0, C4, jnp.int32)
    alpha4 = [0.5, 1.0, 1.5, 2.0, 2.5]
    loss4 = focal_loss(logits4, target4, alpha=alpha4, gamma=3.0,
                       size_average=True, tile_bytes=320)
    jax.block_until_ready(loss4)
    ref4 = _reference_focal_loss(logits4, target4, C4, alpha=alpha4, gamma=3.0,
                                 size_average=True)
    assert jnp.allclose(loss4, ref4, rtol=1e-4, atol=1e-6), (loss4, ref4)

    print("KERNEL_OK")
</pallas_src>

<mosaic_0001>
module attributes {stable_mosaic.version = 11 : i64} {
  func.func @_focal_loss_nchw_kernel(%arg0: i32, %arg1: i32, %arg2: memref<1x4x8x32xf32, #tpu.memory_space<vmem>>, %arg3: memref<1x1x8x32xi32, #tpu.memory_space<vmem>>, %arg4: memref<1x1x1x2xf32, #tpu.memory_space<vmem>>) attributes {dimension_semantics = [#tpu.dimension_semantics<parallel>, #tpu.dimension_semantics<parallel>], iteration_bounds = array<i64: 2, 1>, scalar_prefetch = 0 : i64, scratch_operands = 0 : i64, tpu.core_type = #tpu.core_type<tc>, window_params = [{transform_indices = @transform_0, window_bounds = array<i64: 1, 4, 8, 32>}, {transform_indices = @transform_1, window_bounds = array<i64: 1, 1, 8, 32>}, {transform_indices = @transform_2, window_bounds = array<i64: 1, 1, 1, 2>}]} {
    %c0 = arith.constant 0 : index
    %c0_0 = arith.constant 0 : index
    %c0_1 = arith.constant 0 : index
    %c0_2 = arith.constant 0 : index
    %0 = vector.load %arg3[%c0, %c0_0, %c0_1, %c0_2] : memref<1x1x8x32xi32, #tpu.memory_space<vmem>>, vector<1x1x8x32xi32>
    %1 = vector.shape_cast %0 : vector<1x1x8x32xi32> to vector<8x32xi32>
    %c0_3 = arith.constant 0 : index
    %c0_4 = arith.constant 0 : index
    %c0_5 = arith.constant 0 : index
    %c0_6 = arith.constant 0 : index
    %2 = vector.load %arg2[%c0_3, %c0_4, %c0_5, %c0_6] : memref<1x4x8x32xf32, #tpu.memory_space<vmem>>, vector<1x1x8x32xf32>
    %3 = vector.shape_cast %2 : vector<1x1x8x32xf32> to vector<8x32xf32>
    %c0_7 = arith.constant 0 : index
    %c1 = arith.constant 1 : index
    %c0_8 = arith.constant 0 : index
    %c0_9 = arith.constant 0 : index
    %4 = vector.load %arg2[%c0_7, %c1, %c0_8, %c0_9] : memref<1x4x8x32xf32, #tpu.memory_space<vmem>>, vector<1x1x8x32xf32>
    %5 = vector.shape_cast %4 : vector<1x1x8x32xf32> to vector<8x32xf32>
    %6 = arith.maximumf %3, %5 : vector<8x32xf32>
    %c0_10 = arith.constant 0 : index
    %c2 = arith.constant 2 : index
    %c0_11 = arith.constant 0 : index
    %c0_12 = arith.constant 0 : index
    %7 = vector.load %arg2[%c0_10, %c2, %c0_11, %c0_12] : memref<1x4x8x32xf32, #tpu.memory_space<vmem>>, vector<1x1x8x32xf32>
    %8 = vector.shape_cast %7 : vector<1x1x8x32xf32> to vector<8x32xf32>
    %9 = arith.maximumf %6, %8 : vector<8x32xf32>
    %c0_13 = arith.constant 0 : index
    %c3 = arith.constant 3 : index
    %c0_14 = arith.constant 0 : index
    %c0_15 = arith.constant 0 : index
    %10 = vector.load %arg2[%c0_13, %c3, %c0_14, %c0_15] : memref<1x4x8x32xf32, #tpu.memory_space<vmem>>, vector<1x1x8x32xf32>
    %11 = vector.shape_cast %10 : vector<1x1x8x32xf32> to vector<8x32xf32>
    %12 = arith.maximumf %9, %11 : vector<8x32xf32>
    %c0_16 = arith.constant 0 : index
    %c0_17 = arith.constant 0 : index
    %c0_18 = arith.constant 0 : index
    %c0_19 = arith.constant 0 : index
    %13 = vector.load %arg2[%c0_16, %c0_17, %c0_18, %c0_19] : memref<1x4x8x32xf32, #tpu.memory_space<vmem>>, vector<1x1x8x32xf32>
    %14 = vector.shape_cast %13 : vector<1x1x8x32xf32> to vector<8x32xf32>
    %15 = arith.subf %14, %12 : vector<8x32xf32>
    %16 = math.exp %15 : vector<8x32xf32>
    %c0_i32 = arith.constant 0 : i32
    %17 = vector.broadcast %c0_i32 : i32 to vector<8x32xi32>
    %18 = arith.cmpi eq, %1, %17 : vector<8x32xi32>
    %cst = arith.constant 0.000000e+00 : f32
    %19 = vector.broadcast %cst : f32 to vector<8x32xf32>
    %20 = arith.select %18, %16, %19 : vector<8x32xi1>, vector<8x32xf32>
    %cst_20 = arith.constant 1.000000e+00 : f32
    %cst_21 = arith.constant 0.000000e+00 : f32
    %21 = vector.broadcast %cst_20 : f32 to vector<8x32xf32>
    %22 = vector.broadcast %cst_21 : f32 to vector<8x32xf32>
    %23 = arith.select %18, %21, %22 : vector<8x32xi1>, vector<8x32xf32>
    %c0_22 = arith.constant 0 : index
    %c1_23 = arith.constant 1 : index
    %c0_24 = arith.constant 0 : index
    %c0_25 = arith.constant 0 : index
    %24 = vector.load %arg2[%c0_22, %c1_23, %c0_24, %c0_25] : memref<1x4x8x32xf32, #tpu.memory_space<vmem>>, vector<1x1x8x32xf32>
    %25 = vector.shape_cast %24 : vector<1x1x8x32xf32> to vector<8x32xf32>
    %26 = arith.subf %25, %12 : vector<8x32xf32>
    %27 = math.exp %26 : vector<8x32xf32>
    %c1_i32 = arith.constant 1 : i32
    %28 = vector.broadcast %c1_i32 : i32 to vector<8x32xi32>
    %29 = arith.cmpi eq, %1, %28 : vector<8x32xi32>
    %30 = arith.addf %16, %27 : vector<8x32xf32>
    %cst_26 = arith.constant 0.000000e+00 : f32
    %31 = vector.broadcast %cst_26 : f32 to vector<8x32xf32>
    %32 = arith.select %29, %27, %31 : vector<8x32xi1>, vector<8x32xf32>
    %33 = arith.addf %20, %32 : vector<8x32xf32>
    %cst_27 = arith.constant 1.000000e+00 : f32
    %cst_28 = arith.constant 0.000000e+00 : f32
    %34 = vector.broadcast %cst_27 : f32 to vector<8x32xf32>
    %35 = vector.broadcast %cst_28 : f32 to vector<8x32xf32>
    %36 = arith.select %29, %34, %35 : vector<8x32xi1>, vector<8x32xf32>
    %37 = arith.addf %23, %36 : vector<8x32xf32>
    %c0_29 = arith.constant 0 : index
    %c2_30 = arith.constant 2 : index
    %c0_31 = arith.constant 0 : index
    %c0_32 = arith.constant 0 : index
    %38 = vector.load %arg2[%c0_29, %c2_30, %c0_31, %c0_32] : memref<1x4x8x32xf32, #tpu.memory_space<vmem>>, vector<1x1x8x32xf32>
    %39 = vector.shape_cast %38 : vector<1x1x8x32xf32> to vector<8x32xf32>
    %40 = arith.subf %39, %12 : vector<8x32xf32>
    %41 = math.exp %40 : vector<8x32xf32>
    %c2_i32 = arith.constant 2 : i32
    %42 = vector.broadcast %c2_i32 : i32 to vector<8x32xi32>
    %43 = arith.cmpi eq, %1, %42 : vector<8x32xi32>
    %44 = arith.addf %30, %41 : vector<8x32xf32>
    %cst_33 = arith.constant 0.000000e+00 : f32
    %45 = vector.broadcast %cst_33 : f32 to vector<8x32xf32>
    %46 = arith.select %43, %41, %45 : vector<8x32xi1>, vector<8x32xf32>
    %47 = arith.addf %33, %46 : vector<8x32xf32>
    %cst_34 = arith.constant 1.000000e+00 : f32
    %cst_35 = arith.constant 0.000000e+00 : f32
    %48 = vector.broadcast %cst_34 : f32 to vector<8x32xf32>
    %49 = vector.broadcast %cst_35 : f32 to vector<8x32xf32>
    %50 = arith.select %43, %48, %49 : vector<8x32xi1>, vector<8x32xf32>
    %51 = arith.addf %37, %50 : vector<8x32xf32>
    %c0_36 = arith.constant 0 : index
    %c3_37 = arith.constant 3 : index
    %c0_38 = arith.constant 0 : index
    %c0_39 = arith.constant 0 : index
    %52 = vector.load %arg2[%c0_36, %c3_37, %c0_38, %c0_39] : memref<1x4x8x32xf32, #tpu.memory_space<vmem>>, vector<1x1x8x32xf32>
    %53 = vector.shape_cast %52 : vector<1x1x8x32xf32> to vector<8x32xf32>
    %54 = arith.subf %53, %12 : vector<8x32xf32>
    %55 = math.exp %54 : vector<8x32xf32>
    %c3_i32 = arith.constant 3 : i32
    %56 = vector.broadcast %c3_i32 : i32 to vector<8x32xi32>
    %57 = arith.cmpi eq, %1, %56 : vector<8x32xi32>
    %58 = arith.addf %44, %55 : vector<8x32xf32>
    %cst_40 = arith.constant 0.000000e+00 : f32
    %59 = vector.broadcast %cst_40 : f32 to vector<8x32xf32>
    %60 = arith.select %57, %55, %59 : vector<8x32xi1>, vector<8x32xf32>
    %61 = arith.addf %47, %60 : vector<8x32xf32>
    %cst_41 = arith.constant 1.000000e+00 : f32
    %cst_42 = arith.constant 0.000000e+00 : f32
    %62 = vector.broadcast %cst_41 : f32 to vector<8x32xf32>
    %63 = vector.broadcast %cst_42 : f32 to vector<8x32xf32>
    %64 = arith.select %57, %62, %63 : vector<8x32xi1>, vector<8x32xf32>
    %65 = arith.addf %51, %64 : vector<8x32xf32>
    %66 = arith.divf %61, %58 : vector<8x32xf32>
    %cst_43 = arith.constant 1.000000e-10 : f32
    %67 = vector.broadcast %cst_43 : f32 to vector<8x32xf32>
    %68 = arith.addf %66, %67 : vector<8x32xf32>
    %cst_44 = arith.constant 1.000000e+00 : f32
    %69 = vector.broadcast %cst_44 : f32 to vector<8x32xf32>
    %70 = arith.subf %69, %68 : vector<8x32xf32>
    %71 = arith.mulf %70, %70 : vector<8x32xf32>
    %cst_45 = arith.constant 0.000000e+00 : f32
    %72 = vector.broadcast %cst_45 : f32 to vector<8x32xf32>
    %73 = arith.subf %72, %71 : vector<8x32xf32>
    %74 = math.log %68 : vector<8x32xf32>
    %75 = arith.mulf %73, %74 : vector<8x32xf32>
    %cst_46 = arith.constant dense<0.000000e+00> : vector<8xf32>
    %76 = vector.multi_reduction <add>, %65, %cst_46 [1] : vector<8x32xf32> to vector<8xf32>
    %77 = vector.shape_cast %76 : vector<8xf32> to vector<8x1xf32>
    %cst_47 = arith.constant dense<0.000000e+00> : vector<1xf32>
    %78 = vector.multi_reduction <add>, %77, %cst_47 [0] : vector<8x1xf32> to vector<1xf32>
    %79 = vector.shape_cast %78 : vector<1xf32> to vector<1x1xf32>
    %cst_48 = arith.constant dense<0.000000e+00> : vector<8xf32>
    %80 = vector.multi_reduction <add>, %75, %cst_48 [1] : vector<8x32xf32> to vector<8xf32>
    %81 = vector.shape_cast %80 : vector<8xf32> to vector<8x1xf32>
    %cst_49 = arith.constant dense<0.000000e+00> : vector<1xf32>
    %82 = vector.multi_reduction <add>, %81, %cst_49 [0] : vector<8x1xf32> to vector<1xf32>
    %83 = vector.shape_cast %82 : vector<1xf32> to vector<1x1xf32>
    %c0_50 = arith.constant 0 : index
    %c0_51 = arith.constant 0 : index
    %c0_52 = arith.constant 0 : index
    %c0_53 = arith.constant 0 : index
    %84 = vector.load %arg4[%c0_50, %c0_51, %c0_52, %c0_53] : memref<1x1x1x2xf32, #tpu.memory_space<vmem>>, vector<1x1x1x1xf32>
    %85 = vector.shape_cast %84 : vector<1x1x1x1xf32> to vector<1x1xf32>
    %86 = vector.shape_cast %79 : vector<1x1xf32> to vector<1x1x1x1xf32>
    tpu.vector_store %arg4[%c0_50, %c0_51, %c0_52, %c0_53], %86 {strides = array<i32>} : memref<1x1x1x2xf32, #tpu.memory_space<vmem>>, vector<1x1x1x1xf32>,
    %c0_54 = arith.constant 0 : index
    %c0_55 = arith.constant 0 : index
    %c0_56 = arith.constant 0 : index
    %c1_57 = arith.constant 1 : index
    %87 = vector.load %arg4[%c0_54, %c0_55, %c0_56, %c1_57] : memref<1x1x1x2xf32, #tpu.memory_space<vmem>>, vector<1x1x1x1xf32>
    %88 = vector.shape_cast %87 : vector<1x1x1x1xf32> to vector<1x1xf32>
    %89 = vector.shape_cast %83 : vector<1x1xf32> to vector<1x1x1x1xf32>
    tpu.vector_store %arg4[%c0_54, %c0_55, %c0_56, %c1_57], %89 {strides = array<i32>} : memref<1x1x1x2xf32, #tpu.memory_space<vmem>>, vector<1x1x1x1xf32>,
    return
  }
  func.func @transform_0(%arg0: i32, %arg1: i32) -> (i32, i32, i32, i32) {
    %c0_i32 = arith.constant 0 : i32
    %c0_i32_0 = arith.constant 0 : i32
    %c0_i32_1 = arith.constant 0 : i32
    return %arg0, %c0_i32, %c0_i32_0, %arg1 : i32, i32, i32, i32
  }
  func.func @transform_1(%arg0: i32, %arg1: i32) -> (i32, i32, i32, i32) {
    %c0_i32 = arith.constant 0 : i32
    %c0_i32_0 = arith.constant 0 : i32
    %c0_i32_1 = arith.constant 0 : i32
    return %arg0, %c0_i32, %c0_i32_0, %arg1 : i32, i32, i32, i32
  }
  func.func @transform_2(%arg0: i32, %arg1: i32) -> (i32, i32, i32, i32) {
    %c0_i32 = arith.constant 0 : i32
    %c0_i32_0 = arith.constant 0 : i32
    %c0_i32_1 = arith.constant 0 : i32
    return %arg0, %arg1, %c0_i32, %c0_i32_0 : i32, i32, i32, i32
  }
}

</mosaic_0001>

<bundles_post_ra>
// kernel: tpu_custom_call.1
= control target key start
LH: loop header
LB: loop body
LE: loop exit
PB: predicated region body
PF: predicated region fallthrough
CT: control target
= control target key end

     0   :  { %7 = vsyncpa [#allocation3], 0  ;;  %s905_s0 = inlined_call_operand.hbm [shape: f32[2,4,8,32], index: 0, kind: input, shape index: {}]   ;;  %s906_s1 = inlined_call_operand.hbm [shape: s32[2,1,8,32], index: 1, kind: input, shape index: {}]   ;;  %s907_s2 = inlined_call_operand.hbm [shape: f32[2,1,1,2], index: 2, kind: output, shape index: {}]  }
   0x1   :  { %9 = vsyncpa [#allocation3 + $0x1], 0 }
   0x2   :  { %10 = vsyncpa [#allocation6], 0 }
   0x3   :  { %12 = vsyncpa [#allocation6 + $0x1], 0 }
   0x4   :  { %13 = vsyncpa [#allocation4], 0 }
   0x5   :  { %15 = vsyncpa [#allocation4 + $0x1], 0  ;;  %s679_s9 = smov 0   ;;  %s681_s10 = smov 0  }
   0x6   :  { %s683_s11 = smov 0   ;;  %s685_s12 = smov 0  }
   0x7   :  { %s687_s13 = smov 0   ;;  %s689_s14 = smov 0  }
   0x8 LB: > { %s409_s15 = sadd.s32 4294967295, %s656_s14   ;;  %s410_s16 = sadd.s32 4294967294, %s656_s14   ;;  %s656_s14 = sphi %s689_s14, %s21_s14   ;;  %s652_s13 = sphi %s687_s13, %s926_s13   ;;  %s648_s12 = sphi %s685_s12, %s925_s12   ;;  %s644_s11 = sphi %s683_s11, %s924_s11   ;;  %s640_s10 = sphi %s681_s10, %s923_s10   ;;  %s636_s9 = sphi %s679_s9, %s922_s9  }
   0x9   : > { %s33_s17 = sadd.s32 1, %s652_s13  ;;  %s42_s18 = sadd.s32 1, %s644_s11 }
   0xa   : > { %p35_p0 = scmp.ge.s32.totalorder %s33_s17, 2  ;;  %p49_p1 = scmp.ne.s32.totalorder %s644_s11, %s640_s10 }
   0xb   : > { %p50_p2 = scmp.eq.s32.totalorder %s656_s14, 0  ;;  %p55_p3 = scmp.ne.s32.totalorder %s640_s10, %s636_s9 }
   0xc   : > { %s928_s17 = smov (%p35_p0, %s33_s17), 0  ;;  %p56_p5 = scmp.eq.s32.totalorder %s409_s15, 0 }
   0xd   : > { %p720_p4 = por %p50_p2, %p49_p1  ;;  %s37_s20 = ssub.s32 %s652_s13, %s928_s17 }
   0xe   : > { %p109_p6 = scmp.eq.s32.totalorder %s409_s15, 1  ;;  %p40_p7 = scmp.eq.s32.totalorder %s37_s20, 0 }
   0xf   : > { %p726_p8 = por %p56_p5, %p55_p3  ;;  %p115_p10 = scmp.eq.s32.totalorder %s410_s16, 1 }
  0x10   : > { %p730_p9 = por %p109_p6, %p49_p1  ;;  %p445_p13 = scmp.lt.s32.totalorder %s656_s14, 2 }
  0x11   : > { %s911_s21 = scalar_select %p726_p8, 1, 0 }
  0x12   : > { %s912_s22 = scalar_select %p730_p9, 1, 0 }
  0x13   : > { %s735_s23 = scalar_select %p40_p7, %s644_s11, %s42_s18  }
  0x14   : > { %p737_p11 = por %p115_p10, %p55_p3  ;;  %s744_s25 = sand.u32 1, %s644_s11  }
  0x15   : > { %s413_s26 = sshll.u32 %s744_s25, 5  ;;  %s427_s27 = sshll.u32 %s652_s13, 9 }
  0x16   : > { %s913_s24 = scalar_select %p737_p11, 1, 0 }
  0x17   : > { %s751_s30 = scalar_lea.hbm %s905_s0, %s427_s27  ;;  %s139_s3 = scalar_lea.vmem [#allocation2], %s413_s26 }
  0x18   : > { %s147_s4 = sshll.u32 %s139_s3, 4  ;;  %p757_p0 = pnand %p445_p13, %p720_p4  ;;  %s753_s4 = int_to_ptr.vmem [resolvable:$true] %s147_s4 }
  0x19   : > { %s136_s6 = scalar_lea.sflag [#allocation3], %s744_s25  ;;  %s510_s7 = scalar_lea.hbm %s751_s30, 512 }
  0x1a   : > { %p511_p2 = scmp.ne.s32.totalorder %s751_s30, %s510_s7  ;;  %p512_p3 = pneg %p757_p0 }
  0x1b   : > { %s515_s16 = scalar_lea.hbm %s905_s0, 1024  ;;  %p516_p4 = scmp.lt.u32.totalorder %s751_s30, %s905_s0 }
  0x1c   : > { %p513_p5 = pnand %p512_p3, %p511_p2  ;;  %p517_p7 = scmp.lt.u32.totalorder %s515_s16, %s510_s7 }
  0x1d   : > { %p519_p13 = scmp.lt.u32.totalorder %s510_s7, %s751_s30 }
  0x1e   : > { %p514_p6 = pneg %p513_p5  ;;  %p518_p10 = por %p517_p7, %p516_p4 }
  0x20   : > { %p520_p12 = por %p519_p13, %p518_p10 }
  0x22   : > { %p521_p1 = pnand %p520_p12, %p514_p6 }
  0x24   : > { %524 = shalt.err (!%p521_p1)
}
  0x25   : > { %s525_s20 = scalar_lea.vmem %s753_s4, 512  ;;  %s658_s26 = smov [#allocation2]  }
  0x26   : > { %p526_p2 = scmp.ne.s32.totalorder %s753_s4, %s525_s20  ;;  %s530_s27 = sshll.u32 %s658_s26, 4  ;;  %s531_s27 = int_to_ptr.vmem [resolvable:$false] %s530_s27 }
  0x27   : > { %s532_s28 = scalar_lea.vmem %s531_s27, 1024  ;;  %p533_p9 = scmp.lt.s32.totalorder %s753_s4, %s531_s27 }
  0x28   : > { %p528_p5 = pnand %p526_p2, %p512_p3  ;;  %p534_p4 = scmp.lt.s32.totalorder %s532_s28, %s525_s20 }
  0x2a   : > { %p529_p11 = pneg %p528_p5  ;;  %p535_p7 = por %p534_p4, %p533_p9 }
  0x2c   : > { %p536_p10 = pnand %p535_p7, %p529_p11 }
  0x2e   : > { %539 = shalt.err (!%p536_p10)
}
  0x2f   : > { %s659_s29 = smov 128   ;;  %s660_s3 = smov 8  }
  0x30   : > { %437 = dma.hbm_to_vmem [thread:$0]  (!%p757_p0), %s751_s30, 512, %s753_s4, %s136_s6, %s659_s29, %s659_s29, %s660_s3  }
  0x31   : > { %p174_p12 = scmp.lt.s32.totalorder %s656_s14, 3  ;;  %s416_s7 = sshll.u32 %s744_s25, 3 }
  0x32   : > { %s417_s8 = sshll.u32 %s652_s13, 7  ;;  %p915_p9 = scmp.ge.s32.totalorder %s656_s14, 1 }
  0x33   : > { %s802_s19 = scalar_lea.hbm %s906_s1, %s417_s8  ;;  %s161_s20 = scalar_lea.vmem [#allocation5], %s416_s7 }
  0x34   : > { %p795_p11 = pnand %p915_p9, %p174_p12  ;;  %s169_s26 = sshll.u32 %s161_s20, 4  ;;  %s170_s26 = int_to_ptr.vmem [resolvable:$true] %s169_s26 }
  0x35   : > { %s158_s30 = scalar_lea.sflag [#allocation6], %s744_s25  ;;  %s540_s4 = scalar_lea.hbm %s802_s19, 128 }
  0x36   : > { %s916_s15 = scalar_select %p795_p11, 1, 0 }
  0x37   : > { %p541_p1 = scmp.ne.s32.totalorder %s802_s19, %s540_s4  ;;  %s545_s28 = scalar_lea.hbm %s906_s1, 256 }
  0x38   : > { %p546_p2 = scmp.lt.u32.totalorder %s802_s19, %s906_s1  ;;  %p547_p5 = scmp.lt.u32.totalorder %s545_s28, %s540_s4 }
  0x39   : > { %p543_p6 = pnand %p541_p1, %p512_p3  ;;  %p549_p7 = scmp.lt.u32.totalorder %s540_s4, %s802_s19 }
  0x3a   : > { %p548_p4 = por %p547_p5, %p546_p2 }
  0x3b   : > { %p544_p13 = pneg %p543_p6 }
  0x3c   : > { %p550_p10 = por %p549_p7, %p548_p4 }
  0x3e   : > { %p551_p12 = pnand %p550_p10, %p544_p13 }
  0x40   : > { %554 = shalt.err (!%p551_p12)
}
  0x41   : > { %s555_s25 = scalar_lea.vmem %s170_s26, 128  ;;  %s661_s7 = smov [#allocation5]  }
  0x42   : > { %p556_p9 = scmp.ne.s32.totalorder %s170_s26, %s555_s25  ;;  %s560_s8 = sshll.u32 %s661_s7, 4  ;;  %s561_s8 = int_to_ptr.vmem [resolvable:$false] %s560_s8 }
  0x43   : > { %s562_s16 = scalar_lea.vmem %s561_s8, 256  ;;  %p563_p8 = scmp.lt.s32.totalorder %s170_s26, %s561_s8 }
  0x44   : > { %p558_p1 = pnand %p556_p9, %p512_p3  ;;  %p564_p11 = scmp.lt.s32.totalorder %s562_s16, %s555_s25 }
  0x46   : > { %p559_p6 = pneg %p558_p1  ;;  %p565_p2 = por %p564_p11, %p563_p8 }
  0x48   : > { %p566_p5 = pnand %p565_p2, %p559_p6 }
  0x4a   : > { %569 = shalt.err (!%p566_p5)
}
  0x4b   : > { %440 = dma.hbm_to_vmem [thread:$0]  (!%p757_p0), %s802_s19, 128, %s170_s26, %s158_s30  }
  0x4c   : > { %p917_p13 = scmp.ne.s32.totalorder %s916_s15, 0 }
  0x4d   : > { %s827_s18 = sand.u32 (!%p917_p13), 1, %s640_s10   ;;  %p918_p3 = scmp.ne.s32.totalorder (!%p917_p13), %s911_s21, 0 }
  0x4e   : > { %178 = sbr.rel (%p917_p13) target bundleno = 318 (0x13e), region = 28  ;;  %s419_s20 = sshll.u32 (!%p917_p13), %s827_s18, 5 }
  0x4f   : > { %s181_s4 = scalar_lea.sflag (!%p917_p13), [#allocation3], %s827_s18  ;;  %s184_s6 = scalar_lea.vmem (!%p917_p13), [#allocation2], %s419_s20 }
  0x55   : > { %623 = dma.done.wait (%p918_p3), %s181_s4, 512  }
  0x56   : > { %625 = vsyncadd (%p918_p3), %s181_s4, 4294966784  ;;  %s420_s5 = sshll.u32 %s827_s18, 3  ;;  %s190_s15 = scalar_lea.sflag [#allocation6], %s827_s18 }
  0x57   : > { %s193_s19 = scalar_lea.vmem [#allocation5], %s420_s5 }
  0x58   : > { %627 = dma.done.wait (%p918_p3), %s190_s15, 128  }
  0x59   : > { %629 = vsyncadd (%p918_p3), %s190_s15, 4294967168  ;;  %v218_v0 = vld [vmem:[%s193_s19] sm:$0xff]  ;;  %v422_v4 = vld [vmem:[%s184_s6 + $0x10] sm:$0xff]  ;;  %v662_v6 = vmov 0.0   ;;  %vm271_vm4 = vcmask 261120   ;;  %vm290_vm5 = vcmask 0  }
  0x5a   : > { %v219_v1 = vld [vmem:[%s184_s6] sm:$0xff]  ;;  %v421_v2 = vld [vmem:[%s184_s6 + $0x8] sm:$0xff]  ;;  %vm232_vm0 = vcmp.eq.s32.totalorder %v218_v0, 0  ;;  %vm238_vm1 = vcmp.eq.s32.totalorder %v218_v0, 1  ;;  %vm247_vm2 = vcmp.eq.s32.totalorder %v218_v0, 2  ;;  %v423_v5 = vld [vmem:[%s184_s6 + $0x18] sm:$0xff] }
  0x5b   : > { %v222_v3 = vmax.f32 %v219_v1, %v421_v2  ;;  %v234_v7 = vsel %vm232_vm0, 1.0, %v662_v6  ;;  %v242_v8 = vsel %vm238_vm1, 1.0, %v662_v6  ;;  %v251_v9 = vsel %vm247_vm2, 1.0, %v662_v6  ;;  %s217_s21 = scalar_lea.vmem [#allocation7], %s827_s18  ;;  %s424_s26 = sshll.u32 %s648_s12, 4 }
  0x5c   : > { %v243_v11 = vadd.f32 %v242_v8, %v234_v7  ;;  %vm256_vm3 = vcmp.eq.s32.totalorder %v218_v0, 3  ;;  %s308_s30 = sshll.u32 %s217_s21, 4  ;;  %vm292_vm6 = vcmask 8200   ;;  %s856_s29 = scalar_lea.hbm %s907_s2, %s424_s26  ;;  %s858_s30 = int_to_ptr.vmem [resolvable:$true] %s308_s30 }
  0x5d   : > { %v225_v10 = vmax.f32 %v222_v3, %v422_v4  ;;  %v260_v14 = vsel %vm256_vm3, 1.0, %v662_v6  ;;  %s295_s3 = scalar_lea.sflag [#allocation4], %s827_s18  ;;  %s570_s25 = scalar_lea.vmem %s858_s30, 16 }
  0x5e   : > { %v252_v13 = vadd.f32 %v251_v9, %v243_v11  ;;  %p571_p8 = scmp.ne.s32.totalorder %s858_s30, %s570_s25  ;;  %p919_p0 = scmp.ne.s32.totalorder %s912_s22, 0 }
  0x5f   : > { %v228_v12 = vmax.f32 %v225_v10, %v423_v5  ;;  %s663_s12 = smov [#allocation7]  }
  0x60   : > { %v261_v19 = vadd.f32 %v260_v14, %v252_v13  ;;  %p572_p11 = pnand %p571_p8, %p919_p0  ;;  %s574_s7 = sshll.u32 %s663_s12, 4  ;;  %s575_s7 = int_to_ptr.vmem [resolvable:$false] %s574_s7 }
  0x61   : > { %v229_v15 = vsub.f32 %v219_v1, %v228_v12  ;;  %v235_v16 = vsub.f32 %v421_v2, %v228_v12  ;;  %v244_v17 = vsub.f32 %v422_v4, %v228_v12  ;;  %v253_v18 = vsub.f32 %v423_v5, %v228_v12  ;;  %s576_s8 = scalar_lea.vmem %s575_s7, 32  ;;  %p577_p7 = scmp.lt.s32.totalorder %s858_s30, %s575_s7 }
  0x62   : > { %v272_v24 = vsel %vm271_vm4, %v261_v19, 0.0  ;;  %p573_p4 = pneg %p572_p11  ;;  %p578_p10 = scmp.lt.s32.totalorder %s576_s8, %s570_s25 }
  0x63   : > { %v230_v20 = vmul.f32 1.442695, %v229_v15  ;;  %v236_v21 = vmul.f32 1.442695, %v235_v16  ;;  %v245_v22 = vmul.f32 1.442695, %v244_v17  ;;  %273 = vadd.xlane.f32.xlu0 %v272_v24 }
  0x64   : > { %v254_v23 = vmul.f32 1.442695, %v253_v18  ;;  %p579_p12 = por %p578_p10, %p577_p7 }
  0x65   : > { %498 = vpow2.f32 %v230_v20 }
  0x66   : > { %500 = vpow2.f32 %v236_v21  ;;  %p580_p9 = pnand %p579_p12, %p573_p4 }
  0x67   : > { %502 = vpow2.f32 %v245_v22 }
  0x68   : > { %504 = vpow2.f32 %v254_v23 }
  0x6f   : > { %v499_v25 = vpop.eup %498 }
  0x70   : > { %v501_v26 = vpop.eup %500  ;;  %v233_v32 = vsel %vm232_vm0, %v499_v25, 0.0 }
  0x71   : > { %v503_v27 = vpop.eup %502  ;;  %v239_v28 = vadd.f32 %v501_v26, %v499_v25  ;;  %v240_v30 = vsel %vm238_vm1, %v501_v26, 0.0 }
  0x72   : > { %v505_v29 = vpop.eup %504  ;;  %v241_v34 = vadd.f32 %v240_v30, %v233_v32  ;;  %v249_v35 = vsel %vm247_vm2, %v503_v27, 0.0 }
  0x73   : > { %v248_v31 = vadd.f32 %v503_v27, %v239_v28  ;;  %v258_v37 = vsel %vm256_vm3, %v505_v29, 0.0 }
  0x74   : > { %v250_v36 = vadd.f32 %v249_v35, %v241_v34 }
  0x75   : > { %v257_v33 = vadd.f32 %v505_v29, %v248_v31 }
  0x76   : > { %v259_v38 = vadd.f32 %v258_v37, %v250_v36 }
  0x77   : > { %506 = vrcp.f32 %v257_v33 }
  0x81   : > { %v507_v39 = vpop.eup %506 }
  0x82   : > { %v263_v40 = vmul.f32 %v507_v39, %v259_v38 }
  0x84   : > { %v264_v41 = vadd.f32 1e-10, %v263_v40 }
  0x86   : > { %508 = vlog2.f32 %v264_v41  ;;  %v265_v42 = vsub.f32 1.0, %v264_v41 }
  0x88   : > { %v266_v43 = vmul.f32 %v265_v42, %v265_v42 }
  0x8a   : > { %v267_v44 = vsub.f32 0.0, %v266_v43 }
  0x90   : > { %v509_v45 = vpop.eup %508 }
  0x91   : > { %v269_v46 = vmul.f32 0.6931472, %v509_v45 }
  0x93   : > { %v270_v47 = vmul.f32 %v269_v46, %v267_v44 }
  0x95   : > { %v281_v48 = vsel %vm271_vm4, %v270_v47, 0.0 }
  0x96   : > { %282 = vadd.xlane.f32.xlu0 %v281_v48 }
  0xf0   : > { %v274_v49 = vpop.xlane.xlu0 %273 }
  0xf1   : > { %v275_v50 = vrot.slane %v274_v49, 4 }
  0xf3   : > { %v276_v51 = vadd.f32 %v275_v50, %v274_v49 }
  0xf5   : > { %v277_v52 = vrot.slane %v276_v51, 2 }
  0xf7   : > { %v278_v53 = vadd.f32 %v277_v52, %v276_v51 }
  0xf9   : > { %v279_v54 = vrot.slane %v278_v53, 1 }
  0xfb   : > { %v280_v55 = vadd.f32 %v279_v54, %v278_v53 }
  0xfd   : > { %291 = vst.msk [vmem:[%s217_s21] sm:$0x1] %vm290_vm5, %v280_v55 }
 0x123   : > { %v283_v56 = vpop.xlane.xlu0 %282 }
 0x124   : > { %v284_v57 = vrot.slane %v283_v56, 4 }
 0x126   : > { %v285_v58 = vadd.f32 %v284_v57, %v283_v56 }
 0x128   : > { %v286_v59 = vrot.slane %v285_v58, 2 }
 0x12a   : > { %v287_v60 = vadd.f32 %v286_v59, %v285_v58 }
 0x12c   : > { %v288_v61 = vrot.slane %v287_v60, 1 }
 0x12e   : > { %v289_v62 = vadd.f32 %v288_v61, %v287_v60 }
 0x130   : > { %293 = vst.msk [vmem:[%s217_s21] sm:$0x1] %vm292_vm6, %v289_v62 }
 0x131   : > { %583 = shalt.err (!%p580_p9)
}
 0x132   : > { %s584_s16 = scalar_lea.hbm %s856_s29, 16  ;;  %s588_s4 = scalar_lea.hbm %s907_s2, 32 }
 0x133   : > { %p585_p1 = scmp.ne.s32.totalorder %s856_s29, %s584_s16  ;;  %p589_p5 = scmp.lt.u32.totalorder %s856_s29, %s907_s2 }
 0x134   : > { %p590_p13 = scmp.lt.u32.totalorder %s588_s4, %s584_s16  ;;  %p592_p8 = scmp.lt.u32.totalorder %s584_s16, %s856_s29 }
 0x135   : > { %p586_p6 = pnand %p585_p1, %p919_p0 }
 0x136   : > { %p591_p3 = por %p590_p13, %p589_p5 }
 0x137   : > { %p587_p2 = pneg %p586_p6 }
 0x138   : > { %p593_p11 = por %p592_p8, %p591_p3 }
 0x13a   : > { %p594_p4 = pnand %p593_p11, %p587_p2 }
 0x13c   : > { %597 = shalt.err (!%p594_p4)
}
 0x13d   : > { %432 = dma.vmem_to_hbm [thread:$0]  (%p919_p0), %s858_s30, 16, %s856_s29, %s295_s3  }
 0x13e PF: > { %s320_s15 = sand.u32 1, %s636_s9   ;;  %p920_p7 = scmp.ne.s32.totalorder %s913_s24, 0 }
 0x13f   : > { %p921_p10 = scmp.ge.s32.totalorder %s656_s14, 2  ;;  %s321_s19 = scalar_lea.sflag [#allocation4], %s320_s15 }
 0x141   : > { %p442_p12 = pnand %p921_p10, %p920_p7 }
 0x143   : > { %631 = dma.done.wait (!%p442_p12), %s321_s19, 16  }
 0x144   : > { %633 = vsyncadd (!%p442_p12), %s321_s19, 4294967280  ;;  %s21_s14 = sadd.s32 1, %s656_s14   ;;  %s922_s9 = smov %s640_s10 }
 0x145   : > { %p18_p9 = scmp.ge.s32.totalorder %s21_s14, 4   ;;  %s923_s10 = smov %s644_s11 }
 0x146   : > { %s924_s11 = smov %s735_s23  ;;  %s925_s12 = smov %s652_s13 }
 0x147   : > { %s926_s13 = smov %s928_s17  ;;  %20 = sbr.rel (!%p18_p9) target bundleno = 8 (0x8), region = 89 }
 0x14e   :  { %325 = vsyncpa [#allocation3], 1 }
 0x14f   :  { %327 = vsyncpa [#allocation3 + $0x1], 1 }
 0x150   :  { %328 = vsyncpa [#allocation6], 1 }
 0x151   :  { %330 = vsyncpa [#allocation6 + $0x1], 1 }
 0x152   :  { %331 = vsyncpa [#allocation4], 1 }
 0x153   :  { %333 = vsyncpa [#allocation4 + $0x1], 1 }

</bundles_post_ra>
